<compile_context>
chip_gen: v6e
topology: v6e:2x2x1
jax: 0.10.0
libtpu: 0.0.40
codegen_flags: <defaults>
</compile_context>

<pallas_src>
import functools
import math

import jax
import jax.numpy as jnp
from jax import lax
from jax.experimental import pallas as pl
from jax.experimental.pallas import tpu as pltpu


# ---------------------------------------------------------------------------
# Fused Pallas kernel
# ---------------------------------------------------------------------------
def _transformer_conv(x, ea_ref, bias, w_pack_bf, b_pack, we_bf, c, de):
    """PyG TransformerConv (heads=1, concat=True, root_weight=True) + ReLU.

    w_pack_bf: (F, 4C) bf16 = [Wq | Wk | Wv | Wskip], b_pack: (1, 4C) f32,
    we_bf: (De, C) bf16.  ea_ref: VMEM Ref (De, N, N) f32, one lane-dense plane per
    edge channel.  bias: (N, N) additive mask (0 valid / -1e30 masked).
    """
    # One fused bf16 projection matmul instead of four tiny f32 ones.
    proj = jnp.dot(x.astype(jnp.bfloat16), w_pack_bf,
                   preferred_element_type=jnp.float32) + b_pack              # (N, 4C) f32
    scale = 1.0 / math.sqrt(c)
    q = proj[:, 0 * c:1 * c] * scale        # fold 1/sqrt(C) into q (N*C, not N*N, ops)
    k = proj[:, 1 * c:2 * c]
    v = proj[:, 2 * c:3 * c]
    skip = proj[:, 3 * c:4 * c]

    qb = q.astype(jnp.bfloat16)
    kb = k.astype(jnp.bfloat16)

    # scores_ij = q_i . k_j + q_i . (We e_ij)   (scale already folded into q).
    # NT contractions via dot_general -> no explicit transpose materialization.
    scores = lax.dot_general(qb, kb, (((1,), (1,)), ((), ())),
                             preferred_element_type=jnp.float32)             # (N, N) f32
    qwe = lax.dot_general(qb, we_bf, (((1,), (1,)), ((), ())),
                          preferred_element_type=jnp.float32)                # (N, De) f32
    for d in range(de):                                                      # lane-dense 2D VPU (f32)
        scores = scores + qwe[:, d:d + 1] * ea_ref[d]

    # Masked softmax over incoming edges (axis 1 = source node j), additive bias mask.
    s = scores + bias
    m = jnp.max(s, axis=1, keepdims=True)
    p = jnp.exp(s - m)                           # masked entries -> exp(-1e30) = 0
    denom = jnp.sum(p, axis=1, keepdims=True)    # >= 1 (row max contributes exp(0)=1)
    alpha = p / denom                            # exact: denom is only (N,1)

    # Messages: alpha_ij * (v_j + We e_ij), aggregated over j.
    msg = jnp.dot(alpha.astype(jnp.bfloat16), v.astype(jnp.bfloat16),
                  preferred_element_type=jnp.float32)                        # (N, C)
    # Per-channel sums gathered into (N, De), then one small MXU matmul with We.
    ae = jnp.concatenate(
        [jnp.sum(alpha * ea_ref[d], axis=1, keepdims=True) for d in range(de)],
        axis=1)                                                              # (N, De)
    msg = msg + jnp.dot(ae.astype(jnp.bfloat16), we_bf,
                        preferred_element_type=jnp.float32)

    # Root / skip connection, then the F.relu applied in MOSGEN.forward.
    return jnp.maximum(msg + skip, 0.0)


def mosgen_kernel(x_ref, ea_ref, bias_ref, pool_ref,
                  w1_ref, b1_ref, we1_ref,
                  w2_ref, b2_ref, we2_ref,
                  wfct_ref, bfc_ref,
                  out_ref, *, c1, c2, de):
    """Fused: conv1 + ReLU -> conv2 + ReLU -> global_mean_pool -> Linear -> sigmoid."""
    x = x_ref[...]                        # (N, F) f32
    bias = bias_ref[...]                  # (N, N) f32 additive mask

    h = _transformer_conv(x, ea_ref, bias, w1_ref[...], b1_ref[...], we1_ref[...], c1, de)
    h = _transformer_conv(h, ea_ref, bias, w2_ref[...], b2_ref[...], we2_ref[...], c2, de)

    # global_mean_pool: pool rows already hold 1/|graph_b| for member nodes.
    z = jnp.dot(pool_ref[...].astype(jnp.bfloat16), h.astype(jnp.bfloat16),
                preferred_element_type=jnp.float32)                          # (B, C2)
    # Final Linear + sigmoid as a VPU lane reduction (epilogue MXU drain avoided).
    logits = jnp.sum(z * wfct_ref[...], axis=1, keepdims=True) + bfc_ref[...]
    out_ref[...] = jax.nn.sigmoid(logits)


# ---------------------------------------------------------------------------
# Wrapper
# ---------------------------------------------------------------------------
def _vmem_limit_bytes(n_pad, de):
    # Dominant VMEM residents: eattr (De,N,N) f32 + ~6 (N,N) f32 temporaries
    # (bias / scores / p / alpha / alpha*ea / ...), 2x headroom.  Clamp to ~7/8 of the
    # physical VMEM of whatever generation we are on (64 MiB v7x, 128 MiB v5e/v6e).
    need = 4 * n_pad * n_pad * (de + 6) * 2
    try:
        cap = pltpu.get_tpu_info().vmem_capacity_bytes
    except Exception:
        cap = 64 * 1024 * 1024     # conservative (v7x) fallback
    ceiling = (cap * 7) // 8
    return int(min(max(need, 16 * 1024 * 1024), ceiling))


def mosgen_forward(x, ea, bias, pool, conv1, conv2, wfc, bfc, *, c1=64, c2=16):
    de, n_pad, _ = ea.shape
    b = pool.shape[0]
    w1, b1, we1 = conv1
    w2, b2, we2 = conv2
    # Weights go in as bf16 (MXU-native); biases / mask / activations stay f32.
    args = (x, ea, bias, pool,
            w1.astype(jnp.bfloat16), b1, we1.astype(jnp.bfloat16),
            w2.astype(jnp.bfloat16), b2, we2.astype(jnp.bfloat16),
            wfc.T, bfc)                                   # wfc passed pre-transposed (1, C2)
    kernel = functools.partial(mosgen_kernel, c1=c1, c2=c2, de=de)
    return pl.pallas_call(
        kernel,
        out_shape=jax.ShapeDtypeStruct((b, 1), jnp.float32),
        in_specs=[pl.BlockSpec(memory_space=pltpu.MemorySpace.VMEM)] * len(args),
        out_specs=pl.BlockSpec(memory_space=pltpu.MemorySpace.VMEM),
        compiler_params=pltpu.CompilerParams(
            vmem_limit_bytes=_vmem_limit_bytes(n_pad, de)),
    )(*args)


# ---------------------------------------------------------------------------
# Parameter init (deterministic, PyTorch-Linear-style uniform) + packing
# ---------------------------------------------------------------------------
def linear_init(key, fan_in, fan_out, bias=True):
    k1, k2 = jax.random.split(key)
    bound = 1.0 / math.sqrt(fan_in)
    w = jax.random.uniform(k1, (fan_in, fan_out), jnp.float32, -bound, bound)
    if bias:
        b = jax.random.uniform(k2, (1, fan_out), jnp.float32, -bound, bound)
        return w, b
    return w, None


def make_conv_params(key, in_ch, out_ch, edge_dim):
    keys = jax.random.split(key, 5)
    wq, bq = linear_init(keys[0], in_ch, out_ch)
    wk, bk = linear_init(keys[1], in_ch, out_ch)
    wv, bv = linear_init(keys[2], in_ch, out_ch)
    we, _ = linear_init(keys[3], edge_dim, out_ch, bias=False)   # lin_edge has no bias
    ws, bs = linear_init(keys[4], in_ch, out_ch)                 # lin_skip
    return (wq, bq, wk, bk, wv, bv, we, ws, bs)


def pack_conv_params(params):
    wq, bq, wk, bk, wv, bv, we, ws, bs = params
    w_pack = jnp.concatenate([wq, wk, wv, ws], axis=1)           # (F, 4C)
    b_pack = jnp.concatenate([bq, bk, bv, bs], axis=1)           # (1, 4C)
    return (w_pack, b_pack, we)                                  # we: (De, C)


# ---------------------------------------------------------------------------
# Pure-JAX reference (edge-list based, mirrors PyG TransformerConv), all f32.
# ---------------------------------------------------------------------------
def ref_conv(x, edge_index, edge_attr, params, out_ch):
    wq, bq, wk, bk, wv, bv, we, ws, bs = params
    n = x.shape[0]
    src, dst = edge_index
    q = x @ wq + bq
    k = x @ wk + bk
    v = x @ wv + bv
    ee = edge_attr @ we
    ke = k[src] + ee
    ve = v[src] + ee
    a = jnp.sum(q[dst] * ke, axis=-1) / math.sqrt(out_ch)
    amax = jax.ops.segment_max(a, dst, num_segments=n)
    ex = jnp.exp(a - amax[dst])
    denom = jax.ops.segment_sum(ex, dst, num_segments=n)
    alpha = ex / (denom[dst] + 1e-16)
    out = jax.ops.segment_sum(alpha[:, None] * ve, dst, num_segments=n)
    out = out + x @ ws + bs
    return jnp.maximum(out, 0.0)


def ref_forward(x, edge_index, edge_attr, batch, params1, params2, wfc, bfc, n_graphs):
    h = ref_conv(x, edge_index, edge_attr, params1, 64)
    h = ref_conv(h, edge_index, edge_attr, params2, 16)
    counts = jax.ops.segment_sum(jnp.ones((x.shape[0],), jnp.float32), batch, n_graphs)
    z = jax.ops.segment_sum(h, batch, n_graphs) / counts[:, None]
    return jax.nn.sigmoid(z @ wfc + bfc)


# ---------------------------------------------------------------------------
if __name__ == "__main__":
    dim_node_feats = 8
    dim_edge_feats = 4
    n_graphs = 2
    nodes_per_graph = 8
    n_nodes = n_graphs * nodes_per_graph
    # Pad the node count only to a sublane multiple (8); lanes are always a full
    # 128-wide vreg regardless of logical width, so padding to 128 buys nothing.
    n_pad = ((n_nodes + 7) // 8) * 8          # = 16

    key = jax.random.PRNGKey(0)
    kx, ke, k1, k2, k3 = jax.random.split(key, 5)

    # Node features and graph membership.
    x = jax.random.normal(kx, (n_nodes, dim_node_feats), jnp.float32)
    batch = jnp.repeat(jnp.arange(n_graphs, dtype=jnp.int32), nodes_per_graph)

    # Bidirectional ring edges inside each graph (every node has 2 incoming edges).
    srcs, dsts = [], []
    for g in range(n_graphs):
        base = g * nodes_per_graph
        for i in range(nodes_per_graph):
            for d in (1, -1):
                srcs.append(base + (i + d) % nodes_per_graph)
                dsts.append(base + i)
    src = jnp.array(srcs, dtype=jnp.int32)
    dst = jnp.array(dsts, dtype=jnp.int32)
    edge_index = jnp.stack([src, dst], axis=0)
    n_edges = src.shape[0]
    edge_attr = jax.random.normal(ke, (n_edges, dim_edge_feats), jnp.float32)

    # Dense, padded graph representation for the kernel (glue).
    # Note: the dense scatter drops duplicate (dst, src) edges (fine for simple graphs).
    x_pad = jnp.zeros((n_pad, dim_node_feats), jnp.float32).at[:n_nodes].set(x)
    mask = jnp.zeros((n_pad, n_pad), jnp.float32).at[dst, src].set(1.0)
    bias = jnp.where(mask > 0, 0.0, -1e30).astype(jnp.float32)     # additive softmax mask
    # (De, N, N) layout: one lane-dense (N, N) plane per edge-feature channel.
    ea_dense = (jnp.zeros((dim_edge_feats, n_pad, n_pad), jnp.float32)
                .at[:, dst, src].set(edge_attr.T))
    pool = (jnp.zeros((n_graphs, n_pad), jnp.float32)
            .at[batch, jnp.arange(n_nodes)].set(1.0 / nodes_per_graph))

    # Parameters (deterministic) + packing for the fused kernel.
    params1 = make_conv_params(k1, dim_node_feats, 64, dim_edge_feats)
    params2 = make_conv_params(k2, 64, 16, dim_edge_feats)
    wfc, bfc = linear_init(k3, 16, 1)
    conv1 = pack_conv_params(params1)
    conv2 = pack_conv_params(params2)

    out = mosgen_forward(x_pad, ea_dense, bias, pool, conv1, conv2, wfc, bfc,
                         c1=64, c2=16)
    out = jax.block_until_ready(out)
    assert out.shape == (n_graphs, 1), out.shape

    ref = ref_forward(x, edge_index, edge_attr, batch, params1, params2,
                      wfc, bfc, n_graphs)
    # Tolerance accounts for bf16 MXU operands (f32 accumulation) across both layers.
    assert jnp.allclose(out, ref, atol=1e-2, rtol=1e-2), (out, ref)

    print("KERNEL_OK")
</pallas_src>

<mosaic_0001>
module attributes {stable_mosaic.version = 11 : i64} {
  func.func @mosgen_kernel(%arg0: memref<16x8xf32, #tpu.memory_space<vmem>>, %arg1: memref<4x16x16xf32, #tpu.memory_space<vmem>>, %arg2: memref<16x16xf32, #tpu.memory_space<vmem>>, %arg3: memref<2x16xf32, #tpu.memory_space<vmem>>, %arg4: memref<8x256xbf16, #tpu.memory_space<vmem>>, %arg5: memref<1x256xf32, #tpu.memory_space<vmem>>, %arg6: memref<4x64xbf16, #tpu.memory_space<vmem>>, %arg7: memref<64x64xbf16, #tpu.memory_space<vmem>>, %arg8: memref<1x64xf32, #tpu.memory_space<vmem>>, %arg9: memref<4x16xbf16, #tpu.memory_space<vmem>>, %arg10: memref<1x16xf32, #tpu.memory_space<vmem>>, %arg11: memref<1x1xf32, #tpu.memory_space<vmem>>, %arg12: memref<2x1xf32, #tpu.memory_space<vmem>>) attributes {dimension_semantics = [], scalar_prefetch = 0 : i64, scratch_operands = 0 : i64, tpu.core_type = #tpu.core_type<tc>} {
    %c0 = arith.constant 0 : index
    %c0_0 = arith.constant 0 : index
    %0 = vector.load %arg0[%c0, %c0_0] : memref<16x8xf32, #tpu.memory_space<vmem>>, vector<16x8xf32>
    %c0_1 = arith.constant 0 : index
    %c0_2 = arith.constant 0 : index
    %1 = vector.load %arg2[%c0_1, %c0_2] : memref<16x16xf32, #tpu.memory_space<vmem>>, vector<16x16xf32>
    %c0_3 = arith.constant 0 : index
    %c0_4 = arith.constant 0 : index
    %2 = vector.load %arg4[%c0_3, %c0_4] : memref<8x256xbf16, #tpu.memory_space<vmem>>, vector<8x256xbf16>
    %c0_5 = arith.constant 0 : index
    %c0_6 = arith.constant 0 : index
    %3 = vector.load %arg5[%c0_5, %c0_6] : memref<1x256xf32, #tpu.memory_space<vmem>>, vector<1x256xf32>
    %c0_7 = arith.constant 0 : index
    %c0_8 = arith.constant 0 : index
    %4 = vector.load %arg6[%c0_7, %c0_8] : memref<4x64xbf16, #tpu.memory_space<vmem>>, vector<4x64xbf16>
    %5 = arith.truncf %0 : vector<16x8xf32> to vector<16x8xbf16>
    %cst = arith.constant dense<0.000000e+00> : vector<16x256xf32>
    %6 = tpu.matmul %5, %2, %cst {dimension_numbers = #tpu.dot_dimension_numbers<[1], [0], [0], [1], [0, 0, 1, 1], [], []>} : vector<16x8xbf16>, vector<8x256xbf16>, vector<16x256xf32> -> vector<16x256xf32>
    %7 = vector.broadcast %3 : vector<1x256xf32> to vector<16x256xf32>
    %8 = arith.addf %6, %7 : vector<16x256xf32>
    %9 = vector.extract_strided_slice %8 {offsets = [0, 0], sizes = [16, 64], strides = [1, 1]} : vector<16x256xf32> to vector<16x64xf32>
    %cst_9 = arith.constant 1.250000e-01 : f32
    %10 = vector.broadcast %cst_9 : f32 to vector<16x64xf32>
    %11 = arith.mulf %9, %10 : vector<16x64xf32>
    %12 = vector.extract_strided_slice %8 {offsets = [0, 64], sizes = [16, 64], strides = [1, 1]} : vector<16x256xf32> to vector<16x64xf32>
    %13 = vector.extract_strided_slice %8 {offsets = [0, 128], sizes = [16, 64], strides = [1, 1]} : vector<16x256xf32> to vector<16x64xf32>
    %14 = vector.extract_strided_slice %8 {offsets = [0, 192], sizes = [16, 64], strides = [1, 1]} : vector<16x256xf32> to vector<16x64xf32>
    %15 = arith.truncf %11 : vector<16x64xf32> to vector<16x64xbf16>
    %16 = arith.truncf %12 : vector<16x64xf32> to vector<16x64xbf16>
    %cst_10 = arith.constant dense<0.000000e+00> : vector<16x16xf32>
    %17 = tpu.matmul %15, %16, %cst_10 {dimension_numbers = #tpu.dot_dimension_numbers<[1], [1], [0], [0], [0, 0, 1, 0], [], []>} : vector<16x64xbf16>, vector<16x64xbf16>, vector<16x16xf32> -> vector<16x16xf32>
    %cst_11 = arith.constant dense<0.000000e+00> : vector<16x4xf32>
    %18 = tpu.matmul %15, %4, %cst_11 {dimension_numbers = #tpu.dot_dimension_numbers<[1], [1], [0], [0], [0, 0, 1, 0], [], []>} : vector<16x64xbf16>, vector<4x64xbf16>, vector<16x4xf32> -> vector<16x4xf32>
    %19 = vector.extract_strided_slice %18 {offsets = [0, 0], sizes = [16, 1], strides = [1, 1]} : vector<16x4xf32> to vector<16x1xf32>
    %c0_12 = arith.constant 0 : index
    %c0_13 = arith.constant 0 : index
    %c0_14 = arith.constant 0 : index
    %20 = vector.load %arg1[%c0_12, %c0_13, %c0_14] : memref<4x16x16xf32, #tpu.memory_space<vmem>>, vector<1x16x16xf32>
    %21 = vector.shape_cast %20 : vector<1x16x16xf32> to vector<16x16xf32>
    %22 = vector.broadcast %19 : vector<16x1xf32> to vector<16x16xf32>
    %23 = arith.mulf %22, %21 : vector<16x16xf32>
    %24 = arith.addf %17, %23 : vector<16x16xf32>
    %25 = vector.extract_strided_slice %18 {offsets = [0, 1], sizes = [16, 1], strides = [1, 1]} : vector<16x4xf32> to vector<16x1xf32>
    %c1 = arith.constant 1 : index
    %c0_15 = arith.constant 0 : index
    %c0_16 = arith.constant 0 : index
    %26 = vector.load %arg1[%c1, %c0_15, %c0_16] : memref<4x16x16xf32, #tpu.memory_space<vmem>>, vector<1x16x16xf32>
    %27 = vector.shape_cast %26 : vector<1x16x16xf32> to vector<16x16xf32>
    %28 = vector.broadcast %25 : vector<16x1xf32> to vector<16x16xf32>
    %29 = arith.mulf %28, %27 : vector<16x16xf32>
    %30 = arith.addf %24, %29 : vector<16x16xf32>
    %31 = vector.extract_strided_slice %18 {offsets = [0, 2], sizes = [16, 1], strides = [1, 1]} : vector<16x4xf32> to vector<16x1xf32>
    %c2 = arith.constant 2 : index
    %c0_17 = arith.constant 0 : index
    %c0_18 = arith.constant 0 : index
    %32 = vector.load %arg1[%c2, %c0_17, %c0_18] : memref<4x16x16xf32, #tpu.memory_space<vmem>>, vector<1x16x16xf32>
    %33 = vector.shape_cast %32 : vector<1x16x16xf32> to vector<16x16xf32>
    %34 = vector.broadcast %31 : vector<16x1xf32> to vector<16x16xf32>
    %35 = arith.mulf %34, %33 : vector<16x16xf32>
    %36 = arith.addf %30, %35 : vector<16x16xf32>
    %37 = vector.extract_strided_slice %18 {offsets = [0, 3], sizes = [16, 1], strides = [1, 1]} : vector<16x4xf32> to vector<16x1xf32>
    %c3 = arith.constant 3 : index
    %c0_19 = arith.constant 0 : index
    %c0_20 = arith.constant 0 : index
    %38 = vector.load %arg1[%c3, %c0_19, %c0_20] : memref<4x16x16xf32, #tpu.memory_space<vmem>>, vector<1x16x16xf32>
    %39 = vector.shape_cast %38 : vector<1x16x16xf32> to vector<16x16xf32>
    %40 = vector.broadcast %37 : vector<16x1xf32> to vector<16x16xf32>
    %41 = arith.mulf %40, %39 : vector<16x16xf32>
    %42 = arith.addf %36, %41 : vector<16x16xf32>
    %43 = arith.addf %42, %1 : vector<16x16xf32>
    %cst_21 = arith.constant dense<0xFF800000> : vector<16xf32>
    %44 = vector.multi_reduction <maximumf>, %43, %cst_21 [1] : vector<16x16xf32> to vector<16xf32>
    %45 = vector.shape_cast %44 : vector<16xf32> to vector<16x1xf32>
    %46 = vector.broadcast %45 : vector<16x1xf32> to vector<16x16xf32>
    %47 = arith.subf %43, %46 : vector<16x16xf32>
    %48 = math.exp %47 : vector<16x16xf32>
    %cst_22 = arith.constant dense<0.000000e+00> : vector<16xf32>
    %49 = vector.multi_reduction <add>, %48, %cst_22 [1] : vector<16x16xf32> to vector<16xf32>
    %50 = vector.shape_cast %49 : vector<16xf32> to vector<16x1xf32>
    %51 = vector.broadcast %50 : vector<16x1xf32> to vector<16x16xf32>
    %52 = arith.divf %48, %51 : vector<16x16xf32>
    %53 = arith.truncf %52 : vector<16x16xf32> to vector<16x16xbf16>
    %54 = arith.truncf %13 : vector<16x64xf32> to vector<16x64xbf16>
    %cst_23 = arith.constant dense<0.000000e+00> : vector<16x64xf32>
    %55 = tpu.matmul %53, %54, %cst_23 {dimension_numbers = #tpu.dot_dimension_numbers<[1], [0], [0], [1], [0, 0, 1, 1], [], []>} : vector<16x16xbf16>, vector<16x64xbf16>, vector<16x64xf32> -> vector<16x64xf32>
    %c0_24 = arith.constant 0 : index
    %c0_25 = arith.constant 0 : index
    %c0_26 = arith.constant 0 : index
    %56 = vector.load %arg1[%c0_24, %c0_25, %c0_26] : memref<4x16x16xf32, #tpu.memory_space<vmem>>, vector<1x16x16xf32>
    %57 = vector.shape_cast %56 : vector<1x16x16xf32> to vector<16x16xf32>
    %58 = arith.mulf %52, %57 : vector<16x16xf32>
    %cst_27 = arith.constant dense<0.000000e+00> : vector<16xf32>
    %59 = vector.multi_reduction <add>, %58, %cst_27 [1] : vector<16x16xf32> to vector<16xf32>
    %60 = vector.shape_cast %59 : vector<16xf32> to vector<16x1xf32>
    %c1_28 = arith.constant 1 : index
    %c0_29 = arith.constant 0 : index
    %c0_30 = arith.constant 0 : index
    %61 = vector.load %arg1[%c1_28, %c0_29, %c0_30] : memref<4x16x16xf32, #tpu.memory_space<vmem>>, vector<1x16x16xf32>
    %62 = vector.shape_cast %61 : vector<1x16x16xf32> to vector<16x16xf32>
    %63 = arith.mulf %52, %62 : vector<16x16xf32>
    %cst_31 = arith.constant dense<0.000000e+00> : vector<16xf32>
    %64 = vector.multi_reduction <add>, %63, %cst_31 [1] : vector<16x16xf32> to vector<16xf32>
    %65 = vector.shape_cast %64 : vector<16xf32> to vector<16x1xf32>
    %c2_32 = arith.constant 2 : index
    %c0_33 = arith.constant 0 : index
    %c0_34 = arith.constant 0 : index
    %66 = vector.load %arg1[%c2_32, %c0_33, %c0_34] : memref<4x16x16xf32, #tpu.memory_space<vmem>>, vector<1x16x16xf32>
    %67 = vector.shape_cast %66 : vector<1x16x16xf32> to vector<16x16xf32>
    %68 = arith.mulf %52, %67 : vector<16x16xf32>
    %cst_35 = arith.constant dense<0.000000e+00> : vector<16xf32>
    %69 = vector.multi_reduction <add>, %68, %cst_35 [1] : vector<16x16xf32> to vector<16xf32>
    %70 = vector.shape_cast %69 : vector<16xf32> to vector<16x1xf32>
    %c3_36 = arith.constant 3 : index
    %c0_37 = arith.constant 0 : index
    %c0_38 = arith.constant 0 : index
    %71 = vector.load %arg1[%c3_36, %c0_37, %c0_38] : memref<4x16x16xf32, #tpu.memory_space<vmem>>, vector<1x16x16xf32>
    %72 = vector.shape_cast %71 : vector<1x16x16xf32> to vector<16x16xf32>
    %73 = arith.mulf %52, %72 : vector<16x16xf32>
    %cst_39 = arith.constant dense<0.000000e+00> : vector<16xf32>
    %74 = vector.multi_reduction <add>, %73, %cst_39 [1] : vector<16x16xf32> to vector<16xf32>
    %75 = vector.shape_cast %74 : vector<16xf32> to vector<16x1xf32>
    %76 = tpu.concatenate %60, %65, %70, %75 in 1 : vector<16x1xf32>, vector<16x1xf32>, vector<16x1xf32>, vector<16x1xf32> -> vector<16x4xf32>
    %77 = arith.truncf %76 : vector<16x4xf32> to vector<16x4xbf16>
    %cst_40 = arith.constant dense<0.000000e+00> : vector<16x64xf32>
    %78 = tpu.matmul %77, %4, %cst_40 {dimension_numbers = #tpu.dot_dimension_numbers<[1], [0], [0], [1], [0, 0, 1, 1], [], []>} : vector<16x4xbf16>, vector<4x64xbf16>, vector<16x64xf32> -> vector<16x64xf32>
    %79 = arith.addf %55, %78 : vector<16x64xf32>
    %80 = arith.addf %79, %14 : vector<16x64xf32>
    %cst_41 = arith.constant 0.000000e+00 : f32
    %81 = vector.broadcast %cst_41 : f32 to vector<16x64xf32>
    %82 = arith.maximumf %80, %81 : vector<16x64xf32>
    %c0_42 = arith.constant 0 : index
    %c0_43 = arith.constant 0 : index
    %83 = vector.load %arg7[%c0_42, %c0_43] : memref<64x64xbf16, #tpu.memory_space<vmem>>, vector<64x64xbf16>
    %c0_44 = arith.constant 0 : index
    %c0_45 = arith.constant 0 : index
    %84 = vector.load %arg8[%c0_44, %c0_45] : memref<1x64xf32, #tpu.memory_space<vmem>>, vector<1x64xf32>
    %c0_46 = arith.constant 0 : index
    %c0_47 = arith.constant 0 : index
    %85 = vector.load %arg9[%c0_46, %c0_47] : memref<4x16xbf16, #tpu.memory_space<vmem>>, vector<4x16xbf16>
    %86 = arith.truncf %82 : vector<16x64xf32> to vector<16x64xbf16>
    %cst_48 = arith.constant dense<0.000000e+00> : vector<16x64xf32>
    %87 = tpu.matmul %86, %83, %cst_48 {dimension_numbers = #tpu.dot_dimension_numbers<[1], [0], [0], [1], [0, 0, 1, 1], [], []>} : vector<16x64xbf16>, vector<64x64xbf16>, vector<16x64xf32> -> vector<16x64xf32>
    %88 = vector.broadcast %84 : vector<1x64xf32> to vector<16x64xf32>
    %89 = arith.addf %87, %88 : vector<16x64xf32>
    %90 = vector.extract_strided_slice %89 {offsets = [0, 0], sizes = [16, 16], strides = [1, 1]} : vector<16x64xf32> to vector<16x16xf32>
    %cst_49 = arith.constant 2.500000e-01 : f32
    %91 = vector.broadcast %cst_49 : f32 to vector<16x16xf32>
    %92 = arith.mulf %90, %91 : vector<16x16xf32>
    %93 = vector.extract_strided_slice %89 {offsets = [0, 16], sizes = [16, 16], strides = [1, 1]} : vector<16x64xf32> to vector<16x16xf32>
    %94 = vector.extract_strided_slice %89 {offsets = [0, 32], sizes = [16, 16], strides = [1, 1]} : vector<16x64xf32> to vector<16x16xf32>
    %95 = vector.extract_strided_slice %89 {offsets = [0, 48], sizes = [16, 16], strides = [1, 1]} : vector<16x64xf32> to vector<16x16xf32>
    %96 = arith.truncf %92 : vector<16x16xf32> to vector<16x16xbf16>
    %97 = arith.truncf %93 : vector<16x16xf32> to vector<16x16xbf16>
    %cst_50 = arith.constant dense<0.000000e+00> : vector<16x16xf32>
    %98 = tpu.matmul %96, %97, %cst_50 {dimension_numbers = #tpu.dot_dimension_numbers<[1], [1], [0], [0], [0, 0, 1, 0], [], []>} : vector<16x16xbf16>, vector<16x16xbf16>, vector<16x16xf32> -> vector<16x16xf32>
    %cst_51 = arith.constant dense<0.000000e+00> : vector<16x4xf32>
    %99 = tpu.matmul %96, %85, %cst_51 {dimension_numbers = #tpu.dot_dimension_numbers<[1], [1], [0], [0], [0, 0, 1, 0], [], []>} : vector<16x16xbf16>, vector<4x16xbf16>, vector<16x4xf32> -> vector<16x4xf32>
    %100 = vector.extract_strided_slice %99 {offsets = [0, 0], sizes = [16, 1], strides = [1, 1]} : vector<16x4xf32> to vector<16x1xf32>
    %c0_52 = arith.constant 0 : index
    %c0_53 = arith.constant 0 : index
    %c0_54 = arith.constant 0 : index
    %101 = vector.load %arg1[%c0_52, %c0_53, %c0_54] : memref<4x16x16xf32, #tpu.memory_space<vmem>>, vector<1x16x16xf32>
    %102 = vector.shape_cast %101 : vector<1x16x16xf32> to vector<16x16xf32>
    %103 = vector.broadcast %100 : vector<16x1xf32> to vector<16x16xf32>
    %104 = arith.mulf %103, %102 : vector<16x16xf32>
    %105 = arith.addf %98, %104 : vector<16x16xf32>
    %106 = vector.extract_strided_slice %99 {offsets = [0, 1], sizes = [16, 1], strides = [1, 1]} : vector<16x4xf32> to vector<16x1xf32>
    %c1_55 = arith.constant 1 : index
    %c0_56 = arith.constant 0 : index
    %c0_57 = arith.constant 0 : index
    %107 = vector.load %arg1[%c1_55, %c0_56, %c0_57] : memref<4x16x16xf32, #tpu.memory_space<vmem>>, vector<1x16x16xf32>
    %108 = vector.shape_cast %107 : vector<1x16x16xf32> to vector<16x16xf32>
    %109 = vector.broadcast %106 : vector<16x1xf32> to vector<16x16xf32>
    %110 = arith.mulf %109, %108 : vector<16x16xf32>
    %111 = arith.addf %105, %110 : vector<16x16xf32>
    %112 = vector.extract_strided_slice %99 {offsets = [0, 2], sizes = [16, 1], strides = [1, 1]} : vector<16x4xf32> to vector<16x1xf32>
    %c2_58 = arith.constant 2 : index
    %c0_59 = arith.constant 0 : index
    %c0_60 = arith.constant 0 : index
    %113 = vector.load %arg1[%c2_58, %c0_59, %c0_60] : memref<4x16x16xf32, #tpu.memory_space<vmem>>, vector<1x16x16xf32>
    %114 = vector.shape_cast %113 : vector<1x16x16xf32> to vector<16x16xf32>
    %115 = vector.broadcast %112 : vector<16x1xf32> to vector<16x16xf32>
    %116 = arith.mulf %115, %114 : vector<16x16xf32>
    %117 = arith.addf %111, %116 : vector<16x16xf32>
    %118 = vector.extract_strided_slice %99 {offsets = [0, 3], sizes = [16, 1], strides = [1, 1]} : vector<16x4xf32> to vector<16x1xf32>
    %c3_61 = arith.constant 3 : index
    %c0_62 = arith.constant 0 : index
    %c0_63 = arith.constant 0 : index
    %119 = vector.load %arg1[%c3_61, %c0_62, %c0_63] : memref<4x16x16xf32, #tpu.memory_space<vmem>>, vector<1x16x16xf32>
    %120 = vector.shape_cast %119 : vector<1x16x16xf32> to vector<16x16xf32>
    %121 = vector.broadcast %118 : vector<16x1xf32> to vector<16x16xf32>
    %122 = arith.mulf %121, %120 : vector<16x16xf32>
    %123 = arith.addf %117, %122 : vector<16x16xf32>
    %124 = arith.addf %123, %1 : vector<16x16xf32>
    %cst_64 = arith.constant dense<0xFF800000> : vector<16xf32>
    %125 = vector.multi_reduction <maximumf>, %124, %cst_64 [1] : vector<16x16xf32> to vector<16xf32>
    %126 = vector.shape_cast %125 : vector<16xf32> to vector<16x1xf32>
    %127 = vector.broadcast %126 : vector<16x1xf32> to vector<16x16xf32>
    %128 = arith.subf %124, %127 : vector<16x16xf32>
    %129 = math.exp %128 : vector<16x16xf32>
    %cst_65 = arith.constant dense<0.000000e+00> : vector<16xf32>
    %130 = vector.multi_reduction <add>, %129, %cst_65 [1] : vector<16x16xf32> to vector<16xf32>
    %131 = vector.shape_cast %130 : vector<16xf32> to vector<16x1xf32>
    %132 = vector.broadcast %131 : vector<16x1xf32> to vector<16x16xf32>
    %133 = arith.divf %129, %132 : vector<16x16xf32>
    %134 = arith.truncf %133 : vector<16x16xf32> to vector<16x16xbf16>
    %135 = arith.truncf %94 : vector<16x16xf32> to vector<16x16xbf16>
    %cst_66 = arith.constant dense<0.000000e+00> : vector<16x16xf32>
    %136 = tpu.matmul %134, %135, %cst_66 {dimension_numbers = #tpu.dot_dimension_numbers<[1], [0], [0], [1], [0, 0, 1, 1], [], []>} : vector<16x16xbf16>, vector<16x16xbf16>, vector<16x16xf32> -> vector<16x16xf32>
    %c0_67 = arith.constant 0 : index
    %c0_68 = arith.constant 0 : index
    %c0_69 = arith.constant 0 : index
    %137 = vector.load %arg1[%c0_67, %c0_68, %c0_69] : memref<4x16x16xf32, #tpu.memory_space<vmem>>, vector<1x16x16xf32>
    %138 = vector.shape_cast %137 : vector<1x16x16xf32> to vector<16x16xf32>
    %139 = arith.mulf %133, %138 : vector<16x16xf32>
    %cst_70 = arith.constant dense<0.000000e+00> : vector<16xf32>
    %140 = vector.multi_reduction <add>, %139, %cst_70 [1] : vector<16x16xf32> to vector<16xf32>
    %141 = vector.shape_cast %140 : vector<16xf32> to vector<16x1xf32>
    %c1_71 = arith.constant 1 : index
    %c0_72 = arith.constant 0 : index
    %c0_73 = arith.constant 0 : index
    %142 = vector.load %arg1[%c1_71, %c0_72, %c0_73] : memref<4x16x16xf32, #tpu.memory_space<vmem>>, vector<1x16x16xf32>
    %143 = vector.shape_cast %142 : vector<1x16x16xf32> to vector<16x16xf32>
    %144 = arith.mulf %133, %143 : vector<16x16xf32>
    %cst_74 = arith.constant dense<0.000000e+00> : vector<16xf32>
    %145 = vector.multi_reduction <add>, %144, %cst_74 [1] : vector<16x16xf32> to vector<16xf32>
    %146 = vector.shape_cast %145 : vector<16xf32> to vector<16x1xf32>
    %c2_75 = arith.constant 2 : index
    %c0_76 = arith.constant 0 : index
    %c0_77 = arith.constant 0 : index
    %147 = vector.load %arg1[%c2_75, %c0_76, %c0_77] : memref<4x16x16xf32, #tpu.memory_space<vmem>>, vector<1x16x16xf32>
    %148 = vector.shape_cast %147 : vector<1x16x16xf32> to vector<16x16xf32>
    %149 = arith.mulf %133, %148 : vector<16x16xf32>
    %cst_78 = arith.constant dense<0.000000e+00> : vector<16xf32>
    %150 = vector.multi_reduction <add>, %149, %cst_78 [1] : vector<16x16xf32> to vector<16xf32>
    %151 = vector.shape_cast %150 : vector<16xf32> to vector<16x1xf32>
    %c3_79 = arith.constant 3 : index
    %c0_80 = arith.constant 0 : index
    %c0_81 = arith.constant 0 : index
    %152 = vector.load %arg1[%c3_79, %c0_80, %c0_81] : memref<4x16x16xf32, #tpu.memory_space<vmem>>, vector<1x16x16xf32>
    %153 = vector.shape_cast %152 : vector<1x16x16xf32> to vector<16x16xf32>
    %154 = arith.mulf %133, %153 : vector<16x16xf32>
    %cst_82 = arith.constant dense<0.000000e+00> : vector<16xf32>
    %155 = vector.multi_reduction <add>, %154, %cst_82 [1] : vector<16x16xf32> to vector<16xf32>
    %156 = vector.shape_cast %155 : vector<16xf32> to vector<16x1xf32>
    %157 = tpu.concatenate %141, %146, %151, %156 in 1 : vector<16x1xf32>, vector<16x1xf32>, vector<16x1xf32>, vector<16x1xf32> -> vector<16x4xf32>
    %158 = arith.truncf %157 : vector<16x4xf32> to vector<16x4xbf16>
    %cst_83 = arith.constant dense<0.000000e+00> : vector<16x16xf32>
    %159 = tpu.matmul %158, %85, %cst_83 {dimension_numbers = #tpu.dot_dimension_numbers<[1], [0], [0], [1], [0, 0, 1, 1], [], []>} : vector<16x4xbf16>, vector<4x16xbf16>, vector<16x16xf32> -> vector<16x16xf32>
    %160 = arith.addf %136, %159 : vector<16x16xf32>
    %161 = arith.addf %160, %95 : vector<16x16xf32>
    %cst_84 = arith.constant 0.000000e+00 : f32
    %162 = vector.broadcast %cst_84 : f32 to vector<16x16xf32>
    %163 = arith.maximumf %161, %162 : vector<16x16xf32>
    %c0_85 = arith.constant 0 : index
    %c0_86 = arith.constant 0 : index
    %164 = vector.load %arg3[%c0_85, %c0_86] : memref<2x16xf32, #tpu.memory_space<vmem>>, vector<2x16xf32>
    %165 = arith.truncf %164 : vector<2x16xf32> to vector<2x16xbf16>
    %166 = arith.truncf %163 : vector<16x16xf32> to vector<16x16xbf16>
    %cst_87 = arith.constant dense<0.000000e+00> : vector<2x16xf32>
    %167 = tpu.matmul %165, %166, %cst_87 {dimension_numbers = #tpu.dot_dimension_numbers<[1], [0], [0], [1], [0, 0, 1, 1], [], []>} : vector<2x16xbf16>, vector<16x16xbf16>, vector<2x16xf32> -> vector<2x16xf32>
    %c0_88 = arith.constant 0 : index
    %c0_89 = arith.constant 0 : index
    %168 = vector.load %arg10[%c0_88, %c0_89] : memref<1x16xf32, #tpu.memory_space<vmem>>, vector<1x16xf32>
    %169 = vector.broadcast %168 : vector<1x16xf32> to vector<2x16xf32>
    %170 = arith.mulf %167, %169 : vector<2x16xf32>
    %cst_90 = arith.constant dense<0.000000e+00> : vector<2xf32>
    %171 = vector.multi_reduction <add>, %170, %cst_90 [1] : vector<2x16xf32> to vector<2xf32>
    %172 = vector.shape_cast %171 : vector<2xf32> to vector<2x1xf32>
    %c0_91 = arith.constant 0 : index
    %c0_92 = arith.constant 0 : index
    %173 = vector.load %arg11[%c0_91, %c0_92] : memref<1x1xf32, #tpu.memory_space<vmem>>, vector<1x1xf32>
    %174 = vector.broadcast %173 : vector<1x1xf32> to vector<2x1xf32>
    %175 = arith.addf %172, %174 : vector<2x1xf32>
    %176 = arith.negf %175 : vector<2x1xf32>
    %177 = math.exp %176 : vector<2x1xf32>
    %cst_93 = arith.constant 1.000000e+00 : f32
    %178 = vector.broadcast %cst_93 : f32 to vector<2x1xf32>
    %179 = arith.addf %178, %177 : vector<2x1xf32>
    %180 = arith.divf %178, %179 : vector<2x1xf32>
    %c0_94 = arith.constant 0 : index
    %c0_95 = arith.constant 0 : index
    %181 = vector.load %arg12[%c0_94, %c0_95] : memref<2x1xf32, #tpu.memory_space<vmem>>, vector<2x1xf32>
    tpu.vector_store %arg12[%c0_94, %c0_95], %180 {strides = array<i32>} : memref<2x1xf32, #tpu.memory_space<vmem>>, vector<2x1xf32>,
    return
  }
}

</mosaic_0001>

<bundles_post_ra>
// kernel: tpu_custom_call.1
= control target key start
LH: loop header
LB: loop body
LE: loop exit
PB: predicated region body
PF: predicated region fallthrough
CT: control target
= control target key end

     0   :  { %s1557_s0 = inlined_call_operand.vmem [shape: f32[16,8], index: 0, kind: input, shape index: {}]   ;;  %s1558_s1 = inlined_call_operand.hbm [shape: f32[4,16,16], index: 1, kind: input, shape index: {}]   ;;  %s1559_s2 = inlined_call_operand.hbm [shape: f32[16,16], index: 2, kind: input, shape index: {}]   ;;  %s1560_s3 = inlined_call_operand.vmem [shape: f32[2,16], index: 3, kind: input, shape index: {}]   ;;  %s1561_s4 = inlined_call_operand.hbm [shape: bf16[8,256], index: 4, kind: input, shape index: {}]   ;;  %s1562_s5 = inlined_call_operand.vmem [shape: f32[1,256], index: 5, kind: input, shape index: {}]   ;;  %s1563_s6 = inlined_call_operand.vmem [shape: bf16[4,64], index: 6, kind: input, shape index: {}]   ;;  %s1564_s7 = inlined_call_operand.vmem [shape: bf16[64,64], index: 7, kind: input, shape index: {}]   ;;  %s1565_s8 = inlined_call_operand.hbm [shape: f32[1,64], index: 8, kind: input, shape index: {}]   ;;  %s1566_s9 = inlined_call_operand.vmem [shape: bf16[4,16], index: 9, kind: input, shape index: {}]   ;;  %s1567_s10 = inlined_call_operand.vmem [shape: f32[1,16], index: 10, kind: input, shape index: {}]   ;;  %s1568_s11 = inlined_call_operand.<no memory space> [shape: f32[1,1], index: 11, kind: input, shape index: {}]   ;;  %s1569_s12 = inlined_call_operand.vmem [shape: f32[2,1], index: 12, kind: output, shape index: {}]  }
   0x1   :  { %v17_v0 = vstv %s1568_s11 }
   0x2   :  { %18 = vst [vmem:[#allocation2] sm:$0x1] %v17_v0 }
   0x3   :  { %19 = vsyncpa [#allocation4], 0 }
   0x4   :  { %20 = vsyncpa [#allocation6], 0 }
   0x5   :  { %21 = vsyncpa [#allocation9], 0  ;;  %s1239_s23 = smov [#allocation5]   ;;  %s1240_s25 = smov [#allocation3]  }
   0x6   :  { %s41_s24 = sshll.u32 %s1239_s23, 4  ;;  %s29_s26 = sshll.u32 %s1240_s25, 4  ;;  %s42_s24 = int_to_ptr.vmem [resolvable:$true] %s41_s24  ;;  %s30_s26 = int_to_ptr.vmem [resolvable:$true] %s29_s26 }
   0x7   :  { %s1161_s27 = scalar_lea.vmem %s42_s24, 256  ;;  %p1166_p1 = scmp.lt.s32.totalorder %s42_s24, %s42_s24 }
   0x8   :  { %p1162_p0 = scmp.ne.s32.totalorder %s42_s24, %s1161_s27  ;;  %p1167_p2 = scmp.lt.s32.totalorder %s1161_s27, %s1161_s27 }
   0xa   :  { %p1168_p3 = por %p1167_p2, %p1166_p1 }
   0xc   :  { %p1169_p4 = pnand %p1168_p3, %p1162_p0 }
   0xe   :  { %1172 = shalt.err (!%p1169_p4)
}
   0xf   :  { %s1241_s28 = smov 128   ;;  %s1242_s29 = smov 8  }
  0x10   :  { %47 = dma.hbm_to_vmem [thread:$0]  %s1559_s2, 256, %s42_s24, [#allocation6], %s1241_s28, %s1241_s28, %s1242_s29  }
  0x11   :  { %s1181_s13 = scalar_lea.vmem %s30_s26, 1024  ;;  %p1186_p6 = scmp.lt.s32.totalorder %s30_s26, %s30_s26 }
  0x12   :  { %p1182_p5 = scmp.ne.s32.totalorder %s30_s26, %s1181_s13  ;;  %p1187_p7 = scmp.lt.s32.totalorder %s1181_s13, %s1181_s13 }
  0x14   :  { %p1188_p8 = por %p1187_p7, %p1186_p6 }
  0x16   :  { %p1189_p9 = pnand %p1188_p8, %p1182_p5 }
  0x18   :  { %1192 = shalt.err (!%p1189_p9)
}
  0x19   :  { %35 = dma.hbm_to_vmem [thread:$0]  %s1558_s1, 1024, %s30_s26, [#allocation4], %s1241_s28, %s1241_s28, %s1242_s29  }
  0x1a   :  { %s1243_s16 = smov [#allocation7]   ;;  %s1244_s18 = smov [#allocation8]  }
  0x1b   :  { %s56_s17 = sshll.u32 %s1243_s16, 4  ;;  %s72_s19 = sshll.u32 %s1244_s18, 4  ;;  %s57_s17 = int_to_ptr.vmem [resolvable:$true] %s56_s17  ;;  %s73_s19 = int_to_ptr.vmem [resolvable:$true] %s72_s19 }
  0x1c   :  { %s1201_s20 = scalar_lea.vmem %s57_s17, 128  ;;  %p1206_p11 = scmp.lt.s32.totalorder %s57_s17, %s57_s17 }
  0x1d   :  { %p1202_p10 = scmp.ne.s32.totalorder %s57_s17, %s1201_s20  ;;  %p1207_p12 = scmp.lt.s32.totalorder %s1201_s20, %s1201_s20 }
  0x1f   :  { %p1208_p13 = por %p1207_p12, %p1206_p11 }
  0x21   :  { %p1209_p0 = pnand %p1208_p13, %p1202_p10 }
  0x23   :  { %1212 = shalt.err (!%p1209_p0)
}
  0x24   :  { %59 = dma.hbm_to_vmem [thread:$0]  %s1561_s4, 128, %s57_s17, [#allocation6]  }
  0x25   :  { %s1221_s22 = scalar_lea.vmem %s73_s19, 16  ;;  %s1225_s1 = scalar_lea.vmem %s73_s19, 32 }
  0x26   :  { %p1222_p1 = scmp.ne.s32.totalorder %s73_s19, %s1221_s22  ;;  %p1226_p2 = scmp.lt.s32.totalorder %s73_s19, %s73_s19 }
  0x27   :  { %p1227_p3 = scmp.lt.s32.totalorder %s1225_s1, %s1221_s22 }
  0x29   :  { %p1228_p4 = por %p1227_p3, %p1226_p2 }
  0x2b   :  { %p1229_p5 = pnand %p1228_p4, %p1222_p1 }
  0x2d   :  { %1232 = shalt.err (!%p1229_p5)
}
  0x2e   :  { %75 = dma.hbm_to_vmem [thread:$0]  %s1565_s8, 16, %s73_s19, [#allocation9]  }
  0x2f   :  { %1233 = dma.done.wait [#allocation4], 1024  }
  0x30   :  { %1234 = vsyncadd [#allocation4], 4294966272 }
  0x31   :  { %1235 = dma.done.wait [#allocation6], 384  }
  0x32   :  { %1236 = vsyncadd [#allocation6], 4294966912 }
  0x33   :  { %1237 = dma.done.wait [#allocation9], 16  }
  0x34   :  { %1238 = vsyncadd [#allocation9], 4294967280  ;;  %v1245_v1 = vmov 0   ;;  %v99_v2 = vld [vmem:[#allocation7] sm:$0xff]  ;;  %vm123_vm0 = vcmask 1043456   ;;  %v95_v3 = vld [vmem:[%s1557_s0] sm:$0xff]  ;;  %v104_v12 = vlaneseq }
  0x35   :  { %162 = vmatprep.mubr.bf16.mxu0 %v1245_v1  ;;  %1112 = vset.pattern.permute.xlu0 %v1245_v1  ;;  %v96_v4 = vld [vmem:[%s1557_s0 + $0x8] sm:$0xff]  ;;  %v986_v5 = vcombine.high %v99_v2, %v99_v2  ;;  %v985_v6 = vcombine.low %v99_v2, %v99_v2  ;;  %vm119_vm1 = vcmask 64512   ;;  %v101_v9 = vld [vmem:[%s1563_s6] sm:$0x3]  ;;  %vm177_vm2 = vcmask 523264   ;;  %s1249_s29 = smov 64  }
  0x36   :  { %v102_v8 = vpack.c.bf16 %v96_v4, %v95_v3  ;;  %v1246_v10 = vmov 0.0   ;;  %v182_v11 = vsel %vm177_vm2, %v101_v9, 0  ;;  %vm1247_vm3 = vmmov 0   ;;  %v100_v15 = vld [vmem:[%s1562_s5] sm:$0x3]  ;;  %v1386_v50 = vld [vmem:[#allocation3 + $0x8] sm:$0xff] }
  0x37   :  { %987 = vmatprep.subr.msk.bf16.mxu0 %vm123_vm0, %v986_v5  ;;  %v125_v7 = vsel %vm123_vm0, %v985_v6, 0  ;;  %1030 = vmatprep.subr.bf16.mxu1 %v1246_v10  ;;  %v105_v13 = vshrl.u32 %v104_v12, 7  ;;  %vm404_vm4 = vcmask 1041408   ;;  %v1248_v22 = vmov 1   ;;  %v1384_v49 = vld [vmem:[#allocation3] sm:$0xff]  ;;  %v1389_v53 = vld [vmem:[#allocation3 + $0x18] sm:$0xff] }
  0x38   :  { %145 = vmatpush1.bf16.msra.mxu0 %v125_v7  ;;  %1031 = vmatpush3.bf16.xpose.msra.mxu1 %v182_v11  ;;  %v405_v27 = vsel %vm404_vm4, %v101_v9, 0  ;;  %v1250_v39 = vmov 2   ;;  %v1251_v41 = vmov 3   ;;  %v1392_v56 = vld [vmem:[#allocation3 + $0x10] sm:$0xff]  ;;  %v1395_v59 = vld [vmem:[#allocation3 + $0x28] sm:$0xff]  ;;  %v1397_v60 = vld [vmem:[#allocation3 + $0x20] sm:$0xff] }
  0x39   :  { %1036 = vmatprep.subr.bf16.mxu0 %v1246_v10  ;;  %1042 = vmatprep.subr.bf16.mxu1 %v1246_v10  ;;  %v106_v14 = vsub.s32 0, %v105_v13  ;;  %v110_v28 = vsub.s32 1, %v105_v13  ;;  %v1400_v63 = vld [vmem:[#allocation3 + $0x38] sm:$0xff]  ;;  %v1405_v9 = vld [vmem:[#allocation3 + $0x30] sm:$0xff]  ;;  %v1407_v11 = vld [vmem:[#allocation5 + $0x8] sm:$0xff]  ;;  %vm333_vm5 = vcmask 130048  }
  0x3a   :  { %1032 = vmatprep.mubr.msk.bf16.mxu1 %vm1247_vm3, %v1246_v10  ;;  %1113 = vset.pattern.permute.xlu1 %v1248_v22  ;;  %vm390_vm6 = vcmask 7168   ;;  %vm393_vm7 = vcmask 15360   ;;  %vm396_vm8 = vcmask 23552   ;;  %vm400_vm9 = vcmask 31744   ;;  %s1253_s19 = smov 96   ;;  %s1254_s20 = smov 80  }
  0x3b   :  { %988 = vmatmul.mubr.msk.bf16.vlgmr.msra.gmra.mxu0 %vm119_vm1, %v102_v8  ;;  %v107_v16 = vrot.slane %v100_v15, %v106_v14  ;;  %v111_v32 = vrot.slane %v100_v15, %v110_v28  ;;  %vm958_vm10 = vcmask 123904   ;;  %vm976_vm11 = vcmask 1024  }
  0x3c   :  { %1038 = vmatprep.mubr.msk.bf16.mxu0 %vm1247_vm3, %v1246_v10 }
  0xfb   :  { %v164_v17 = vpop.f32.mrf.mxu0 }
  0xfc   :  { %v165_v19 = vadd.f32 %v164_v17, %v107_v16  ;;  %v1411_v17 = vld [vmem:[#allocation5] sm:$0xff] }
  0xfd   :  { %v166_v18 = vpop.f32.mrf.mxu0 }
  0xfe   :  { %v173_v23 = vmul.f32 0.125, %v165_v19  ;;  %v1368_v34 = vadd.f32 %v166_v18, %v111_v32 }
  0xff   :  { %v168_v20 = vpop.f32.mrf.mxu0 }
 0x100   :  { %v169_v21 = vadd.f32 %v168_v20, %v107_v16 }
 0x101   :  { %v170_v30 = vpop.f32.mrf.mxu0 }
 0x102   :  { %v174_v24 = vmul.f32 0.125, %v169_v21  ;;  %v176_v25 = vpack.c.bf16 %v169_v21, %v165_v19  ;;  %v1366_v33 = vadd.f32 %v170_v30, %v111_v32 }
 0x104   :  { %v175_v26 = vpack.c.bf16 %v174_v24, %v173_v23  ;;  %240 = vrot.lane.b32.xlu0 %v176_v25, %s1249_s29  ;;  %v357_v35 = vpack.c.bf16 %v1366_v33, %v1368_v34 }
 0x106   :  { %1033 = vmatmul.mubr.msk.bf16.vlgmr.msra.gmra.mxu1 %vm177_vm2, %v175_v26 }
 0x107   :  { %1043 = vmatpush3.bf16.msra.mxu1 %v405_v27  ;;  %1044 = vmatprep.mubr.msk.bf16.mxu1 %vm1247_vm3, %v1246_v10 }
 0x108   :  { %1054 = vmatprep.subr.bf16.mxu1 %v1246_v10 }
 0x176   :  { %v241_v29 = vpop.permute.xlu0 %240 }
 0x177   :  { %v243_v31 = vsel %vm177_vm2, %v241_v29, 0 }
 0x178   :  { %1037 = vmatpush3.bf16.xpose.msra.mxu0 %v243_v31 }
 0x179   :  { %1048 = vmatprep.subr.bf16.mxu0 %v1246_v10 }
 0x17f   :  { %1039 = vmatmul.mubr.msk.bf16.vlgmr.msra.gmra.mxu0 %vm177_vm2, %v175_v26 }
 0x180   :  { %1049 = vmatpush3.bf16.msra.mxu0 %v357_v35  ;;  %1050 = vmatprep.mubr.msk.bf16.mxu0 %vm1247_vm3, %v1246_v10 }
 0x181   :  { %1066 = vmatprep.subr.bf16.mxu0 %v1246_v10 }
 0x1c6   :  { %v218_v36 = vpop.f32.mrf.mxu1 }
 0x1c7   :  { %290 = vperm.xlu1 %1113, %v218_v36   ;;  %229 = vperm.xlu0 %1112, %v218_v36  }
 0x1c8   :  { %v1034_v37 = vpop.f32.mrf.mxu1 }
 0x1ca   :  { %v221_v38 = vpop.f32.mrf.mxu1 }
 0x1cb   :  { %1115 = vset.pattern.permute.xlu1 %v1245_v1  ;;  %1114 = vset.pattern.permute.xlu0 %v1250_v39 }
 0x1cc   :  { %305 = vperm.xlu0 %1114, %v218_v36   ;;  %234 = vperm.xlu1 %1115, %v221_v38   ;;  %v1035_v40 = vpop.f32.mrf.mxu1 }
 0x1d0   :  { %1119 = vset.pattern.permute.xlu0 %v1251_v41  ;;  %1116 = vset.pattern.permute.xlu1 %v1248_v22 }
 0x1d1   :  { %324 = vperm.xlu0 %1119, %v221_v38   ;;  %294 = vperm.xlu1 %1116, %v221_v38  }
 0x1d5   :  { %1117 = vset.pattern.permute.xlu1 %v1250_v39  ;;  %1122 = vset.pattern.permute.xlu0 %v1250_v39 }
 0x1d6   :  { %309 = vperm.xlu1 %1117, %v221_v38  }
 0x1da   :  { %1118 = vset.pattern.permute.xlu1 %v1251_v41 }
 0x1db   :  { %320 = vperm.xlu1 %1118, %v218_v36  }
 0x1df   :  { %1120 = vset.pattern.permute.xlu1 %v1245_v1 }
 0x23f   :  { %v279_v42 = vpop.f32.mrf.mxu0 }
 0x241   :  { %v1040_v43 = vpop.f32.mrf.mxu0 }
 0x242   :  { %v291_v44 = vpop.permute.xlu1 %290  ;;  %v230_v46 = vpop.permute.xlu0 %229 }
 0x243   :  { %v282_v45 = vpop.f32.mrf.mxu0  ;;  %v237_v51 = vmul.f32 %v230_v46, %v1384_v49  ;;  %v297_v62 = vmul.f32 %v291_v44, %v1392_v56 }
 0x245   :  { %v1041_v47 = vpop.f32.mrf.mxu0  ;;  %v280_v58 = vadd.f32 %v279_v42, %v237_v51 }
 0x247   :  { %v235_v48 = vpop.permute.xlu1 %234  ;;  %v306_v52 = vpop.permute.xlu0 %305  ;;  %v299_v5 = vadd.f32 %v297_v62, %v280_v58 }
 0x248   :  { %v238_v54 = vmul.f32 %v235_v48, %v1386_v50  ;;  %v312_v6 = vmul.f32 %v306_v52, %v1397_v60 }
 0x24a   :  { %v283_v61 = vadd.f32 %v282_v45, %v238_v54  ;;  %v314_v14 = vadd.f32 %v312_v6, %v299_v5 }
 0x24c   :  { %v295_v55 = vpop.permute.xlu1 %294  ;;  %v325_v0 = vpop.permute.xlu0 %324 }
 0x24d   :  { %v298_v57 = vmul.f32 %v295_v55, %v1389_v53  ;;  %v328_v7 = vmul.f32 %v325_v0, %v1400_v63 }
 0x24f   :  { %v300_v3 = vadd.f32 %v298_v57, %v283_v61 }
 0x251   :  { %v310_v2 = vpop.permute.xlu1 %309 }
 0x252   :  { %v313_v4 = vmul.f32 %v310_v2, %v1395_v59 }
 0x254   :  { %v315_v8 = vadd.f32 %v313_v4, %v300_v3 }
 0x256   :  { %v321_v12 = vpop.permute.xlu1 %320  ;;  %v330_v13 = vadd.f32 %v328_v7, %v315_v8 }
 0x257   :  { %v327_v15 = vmul.f32 %v321_v12, %v1405_v9 }
 0x258   :  { %v332_v16 = vadd.f32 %v330_v13, %v1407_v11 }
 0x259   :  { %v329_v18 = vadd.f32 %v327_v15, %v314_v14 }
 0x25a   :  { %v337_v19 = vsel %vm333_vm5, %v332_v16, -inf }
 0x25b   :  { %338 = vmax.xlane.f32.xlu0 %v337_v19  ;;  %v331_v20 = vadd.f32 %v329_v18, %v1411_v17 }
 0x25d   :  { %v334_v21 = vsel %vm333_vm5, %v331_v20, -inf }
 0x25e   :  { %335 = vmax.xlane.f32.xlu1 %v334_v21 }
 0x2e4   :  { %v339_v23 = vpop.xlane.xlu0 %338 }
 0x2e5   :  { %v341_v24 = vsub.f32 %v332_v16, %v339_v23 }
 0x2e7   :  { %v344_v25 = vmul.f32 1.442695, %v341_v24  ;;  %v336_v26 = vpop.xlane.xlu1 %335 }
 0x2e8   :  { %v340_v27 = vsub.f32 %v331_v20, %v336_v26  ;;  %v1129_v20 = vld [vmem:[%s1564_s7 + $0x18] sm:$0xff]  }
 0x2e9   :  { %1133 = vpow2.f32 %v344_v25 }
 0x2ea   :  { %v342_v28 = vmul.f32 1.442695, %v340_v27  ;;  %v1130_v27 = vld [vmem:[%s1564_s7 + $0x10] sm:$0xff]  }
 0x2ec   :  { %1135 = vpow2.f32 %v342_v28  ;;  %v1131_v28 = vld [vmem:[%s1564_s7 + $0x8] sm:$0xff]  }
 0x2f6   :  { %v1134_v29 = vpop.eup %1133 }
 0x2f7   :  { %v349_v30 = vsel %vm333_vm5, %v1134_v29, 0.0 }
 0x2f8   :  { %350 = vadd.xlane.f32.xlu0 %v349_v30 }
 0x2f9   :  { %v1136_v31 = vpop.eup %1135 }
 0x2fa   :  { %v346_v32 = vsel %vm333_vm5, %v1136_v31, 0.0 }
 0x2fb   :  { %347 = vadd.xlane.f32.xlu1 %v346_v32 }
 0x381   :  { %v351_v35 = vpop.xlane.xlu0 %350 }
 0x382   :  { %1137 = vrcp.f32 %v351_v35 }
 0x384   :  { %v348_v36 = vpop.xlane.xlu1 %347 }
 0x385   :  { %1139 = vrcp.f32 %v348_v36 }
 0x38f   :  { %v1138_v37 = vpop.eup %1137 }
 0x390   :  { %v355_v38 = vmul.f32 %v1138_v37, %v1134_v29  ;;  %v1132_v29 = vld [vmem:[%s1564_s7] sm:$0xff]  }
 0x392   :  { %v1140_v40 = vpop.eup %1139  ;;  %v359_v42 = vmul.f32 %v355_v38, %v1386_v50  ;;  %v367_v45 = vmul.f32 %v355_v38, %v1389_v53  ;;  %v375_v54 = vmul.f32 %v355_v38, %v1395_v59  ;;  %v383_v61 = vmul.f32 %v355_v38, %v1400_v63 }
 0x393   :  { %v353_v43 = vmul.f32 %v1140_v40, %v1136_v31 }
 0x394   :  { %v363_v44 = vsel %vm333_vm5, %v359_v42, 0.0  ;;  %v371_v52 = vsel %vm333_vm5, %v367_v45, 0.0  ;;  %v379_v58 = vsel %vm333_vm5, %v375_v54, 0.0  ;;  %v387_v2 = vsel %vm333_vm5, %v383_v61, 0.0 }
 0x395   :  { %364 = vadd.xlane.f32.xlu0 %v363_v44  ;;  %v356_v46 = vpack.c.bf16 %v355_v38, %v353_v43  ;;  %v358_v47 = vmul.f32 %v353_v43, %v1384_v49  ;;  %v366_v51 = vmul.f32 %v353_v43, %v1392_v56  ;;  %v374_v57 = vmul.f32 %v353_v43, %v1397_v60 }
 0x396   :  { %v382_v0 = vmul.f32 %v353_v43, %v1405_v9 }
 0x397   :  { %1051 = vmatmul.mubr.msk.bf16.vlgmr.msra.gmra.mxu0 %vm333_vm5, %v356_v46  ;;  %v360_v48 = vsel %vm333_vm5, %v358_v47, 0.0  ;;  %v368_v55 = vsel %vm333_vm5, %v366_v51, 0.0  ;;  %v376_v62 = vsel %vm333_vm5, %v374_v57, 0.0  ;;  %v1472_v47 = vld [vmem:[%s1566_s9] sm:$0x3]  ;;  %s1252_s9 = smov 112  }
 0x398   :  { %361 = vadd.xlane.f32.xlu1 %v360_v48  ;;  %1068 = vmatprep.mubr.msk.bf16.mxu0 %vm1247_vm3, %v1246_v10  ;;  %v384_v3 = vsel %vm333_vm5, %v382_v0, 0.0  ;;  %v597_v48 = vsel %vm333_vm5, %v1472_v47, 0  ;;  %v993_v51 = vld [vmem:[#allocation8] ss:$0 sm:$0xff] }
 0x399   :  { %372 = vadd.xlane.f32.xlu0 %v371_v52  ;;  %1067 = vmatpush3.bf16.xpose.msra.mxu0 %v597_v48 }
 0x39a   :  { %1072 = vmatprep.subr.bf16.mxu0 %v1246_v10 }
 0x39c   :  { %369 = vadd.xlane.f32.xlu1 %v368_v55 }
 0x39d   :  { %380 = vadd.xlane.f32.xlu0 %v379_v58 }
 0x3a0   :  { %377 = vadd.xlane.f32.xlu1 %v376_v62 }
 0x3a1   :  { %388 = vadd.xlane.f32.xlu0 %v387_v2 }
 0x3a4   :  { %385 = vadd.xlane.f32.xlu1 %v384_v3 }
 0x3b5   :  { %494 = vrot.lane.b32.xlu1 %v1368_v34, %s1249_s29 }
 0x3b7   :  { %496 = vrot.lane.b32.xlu0 %v1366_v33, %s1249_s29 }
 0x41e   :  { %v365_v4 = vpop.xlane.xlu0 %364 }
 0x421   :  { %v362_v5 = vpop.xlane.xlu1 %361 }
 0x422   :  { %v373_v6 = vpop.xlane.xlu0 %372 }
 0x423   :  { %v392_v14 = vsel %vm390_vm6, %v365_v4, %v373_v6 }
 0x425   :  { %v370_v7 = vpop.xlane.xlu1 %369 }
 0x426   :  { %v381_v8 = vpop.xlane.xlu0 %380  ;;  %v391_v15 = vsel %vm390_vm6, %v362_v5, %v370_v7 }
 0x427   :  { %v395_v16 = vsel %vm393_vm7, %v392_v14, %v381_v8 }
 0x429   :  { %v378_v12 = vpop.xlane.xlu1 %377 }
 0x42a   :  { %v389_v13 = vpop.xlane.xlu0 %388  ;;  %v394_v34 = vsel %vm393_vm7, %v391_v15, %v378_v12 }
 0x42b   :  { %v398_v33 = vsel %vm396_vm8, %v395_v16, %v389_v13 }
 0x42d   :  { %v386_v18 = vpop.xlane.xlu1 %385 }
 0x42e   :  { %v397_v19 = vsel %vm396_vm8, %v394_v34, %v386_v18  ;;  %v497_v40 = vpop.permute.xlu0 %496 }
 0x42f   :  { %v399_v21 = vpack.c.bf16 %v398_v33, %v397_v19 }
 0x431   :  { %1045 = vmatmul.mubr.msk.bf16.vlgmr.msra.gmra.mxu1 %vm400_vm9, %v399_v21  ;;  %v495_v35 = vpop.permute.xlu1 %494 }
 0x432   :  { %1055 = vmatpush3.bf16.msra.mxu1 %v1129_v20  ;;  %1062 = vmatprep.mubr.msk.bf16.mxu1 %vm1247_vm3, %v1246_v10 }
 0x433   :  { %1056 = vmatprep.subr.bf16.mxu1 %v1246_v10 }
 0x436   :  { %1057 = vmatpush3.bf16.msra.mxu1 %v1130_v27 }
 0x437   :  { %1058 = vmatprep.subr.bf16.mxu1 %v1246_v10 }
 0x43a   :  { %1059 = vmatpush3.bf16.msra.mxu1 %v1131_v28 }
 0x43b   :  { %1060 = vmatprep.subr.bf16.mxu1 %v1246_v10 }
 0x43e   :  { %1061 = vmatpush3.bf16.msra.mxu1 %v1132_v29 }
 0x43f   :  { %1078 = vmatprep.subr.bf16.mxu1 %v1246_v10 }
 0x457   :  { %v485_v23 = vpop.f32.mrf.mxu0 }
 0x459   :  { %v1052_v24 = vpop.f32.mrf.mxu0 }
 0x45b   :  { %v488_v25 = vpop.f32.mrf.mxu0 }
 0x45d   :  { %v1053_v26 = vpop.f32.mrf.mxu0 }
 0x4f1   :  { %v441_v30 = vpop.f32.mrf.mxu1 }
 0x4f2   :  { %v486_v31 = vadd.f32 %v485_v23, %v441_v30 }
 0x4f3   :  { %v1046_v32 = vpop.f32.mrf.mxu1 }
 0x4f4   :  { %v500_v37 = vadd.f32 %v495_v35, %v486_v31 }
 0x4f5   :  { %v444_v36 = vpop.f32.mrf.mxu1 }
 0x4f6   :  { %v489_v38 = vadd.f32 %v488_v25, %v444_v36  ;;  %v502_v44 = vmax.f32 %v500_v37, 0.0 }
 0x4f7   :  { %v1047_v42 = vpop.f32.mrf.mxu1 }
 0x4f8   :  { %v501_v43 = vadd.f32 %v497_v40, %v489_v38 }
 0x4fa   :  { %v503_v45 = vmax.f32 %v501_v43, 0.0 }
 0x4fc   :  { %v514_v46 = vpack.c.bf16 %v503_v45, %v502_v44 }
 0x4fe   :  { %1063 = vmatmul.mubr.msk.bf16.vlgmr.msra.gmra.mxu1 %vm177_vm2, %v514_v46 }
 0x4ff   :  { %1080 = vmatprep.mubr.msk.bf16.mxu1 %vm1247_vm3, %v1246_v10 }
 0x5be   :  { %v582_v52 = vpop.f32.mrf.mxu1 }
 0x5bf   :  { %v1477_v55 = vadd.f32 %v993_v51, %v582_v52 }
 0x5c0   :  { %v1064_v54 = vpop.f32.mrf.mxu1 }
 0x5c1   :  { %v589_v62 = vmul.f32 0.25, %v1477_v55 }
 0x5c2   :  { %v585_v57 = vpop.f32.mrf.mxu1 }
 0x5c3   :  { %v1479_v58 = vadd.f32 %v993_v51, %v585_v57 }
 0x5c4   :  { %v1065_v61 = vpop.f32.mrf.mxu1 }
 0x5c5   :  { %v590_v0 = vmul.f32 0.25, %v1479_v58  ;;  %v1485_v2 = vpack.c.bf16 %v1479_v58, %v1477_v55 }
 0x5c7   :  { %v591_v3 = vpack.c.bf16 %v590_v0, %v589_v62  ;;  %653 = vrot.lane.b32.xlu1 %v1485_v2, %s1252_s9 }
 0x5c9   :  { %1069 = vmatmul.mubr.msk.bf16.vlgmr.msra.gmra.mxu0 %vm333_vm5, %v591_v3 }
 0x5ca   :  { %1074 = vmatprep.mubr.msk.bf16.mxu0 %vm1247_vm3, %v1246_v10 }
 0x639   :  { %v654_v4 = vpop.permute.xlu1 %653 }
 0x63a   :  { %v656_v5 = vsel %vm333_vm5, %v654_v4, 0 }
 0x63b   :  { %1073 = vmatpush3.bf16.xpose.msra.mxu0 %v656_v5 }
 0x63c   :  { %1084 = vmatprep.subr.bf16.mxu0 %v1246_v10 }
 0x642   :  { %1075 = vmatmul.mubr.msk.bf16.vlgmr.msra.gmra.mxu0 %vm333_vm5, %v591_v3 }
 0x643   :  { %1086 = vmatprep.mubr.msk.bf16.mxu0 %vm1247_vm3, %v1246_v10 }
 0x689   :  { %v633_v6 = vpop.f32.mrf.mxu0 }
 0x68a   :  { %712 = vperm.xlu0 %1122, %v633_v6   ;;  %642 = vperm.xlu1 %1120, %v633_v6  }
 0x68b   :  { %v1070_v7 = vpop.f32.mrf.mxu0 }
 0x68d   :  { %v636_v8 = vpop.f32.mrf.mxu0 }
 0x68e   :  { %1123 = vset.pattern.permute.xlu0 %v1245_v1  ;;  %1121 = vset.pattern.permute.xlu1 %v1248_v22 }
 0x68f   :  { %700 = vperm.xlu1 %1121, %v633_v6   ;;  %647 = vperm.xlu0 %1123, %v636_v8   ;;  %v1071_v12 = vpop.f32.mrf.mxu0 }
 0x693   :  { %704 = vperm.xlu1 %1121, %v636_v8   ;;  %1126 = vset.pattern.permute.xlu0 %v1251_v41 }
 0x694   :  { %728 = vperm.xlu0 %1126, %v636_v8  }
 0x697   :  { %1124 = vset.pattern.permute.xlu1 %v1250_v39 }
 0x698   :  { %716 = vperm.xlu1 %1124, %v636_v8  }
 0x69c   :  { %1125 = vset.pattern.permute.xlu1 %v1251_v41 }
 0x69d   :  { %724 = vperm.xlu1 %1125, %v633_v6  }
 0x702   :  { %v692_v13 = vpop.f32.mrf.mxu0 }
 0x704   :  { %v1076_v14 = vpop.f32.mrf.mxu0 }
 0x705   :  { %v713_v15 = vpop.permute.xlu0 %712  ;;  %v643_v16 = vpop.permute.xlu1 %642 }
 0x706   :  { %v695_v1 = vpop.f32.mrf.mxu0  ;;  %v650_v20 = vmul.f32 %v643_v16, %v1384_v49  ;;  %v719_v31 = vmul.f32 %v713_v15, %v1397_v60 }
 0x708   :  { %v1077_v34 = vpop.f32.mrf.mxu0  ;;  %v693_v41 = vadd.f32 %v692_v13, %v650_v20 }
 0x70a   :  { %v701_v22 = vpop.permute.xlu1 %700  ;;  %v648_v18 = vpop.permute.xlu0 %647 }
 0x70b   :  { %v651_v33 = vmul.f32 %v648_v18, %v1386_v50  ;;  %v707_v39 = vmul.f32 %v701_v22, %v1392_v56 }
 0x70d   :  { %v696_v23 = vadd.f32 %v695_v1, %v651_v33  ;;  %v709_v28 = vadd.f32 %v707_v39, %v693_v41 }
 0x70e   :  { %v705_v19 = vpop.permute.xlu1 %704 }
 0x70f   :  { %v708_v21 = vmul.f32 %v705_v19, %v1389_v53  ;;  %v729_v24 = vpop.permute.xlu0 %728  ;;  %v721_v36 = vadd.f32 %v719_v31, %v709_v28 }
 0x710   :  { %v732_v29 = vmul.f32 %v729_v24, %v1400_v63 }
 0x711   :  { %v710_v26 = vadd.f32 %v708_v21, %v696_v23 }
 0x713   :  { %v717_v25 = vpop.permute.xlu1 %716 }
 0x714   :  { %v720_v27 = vmul.f32 %v717_v25, %v1395_v59 }
 0x716   :  { %v722_v30 = vadd.f32 %v720_v27, %v710_v26 }
 0x718   :  { %v725_v32 = vpop.permute.xlu1 %724  ;;  %v734_v35 = vadd.f32 %v732_v29, %v722_v30 }
 0x719   :  { %v731_v37 = vmul.f32 %v725_v32, %v1405_v9 }
 0x71a   :  { %v736_v38 = vadd.f32 %v734_v35, %v1407_v11 }
 0x71b   :  { %v733_v40 = vadd.f32 %v731_v37, %v721_v36 }
 0x71c   :  { %v740_v42 = vsel %vm333_vm5, %v736_v38, -inf }
 0x71d   :  { %741 = vmax.xlane.f32.xlu0 %v740_v42  ;;  %v735_v43 = vadd.f32 %v733_v40, %v1411_v17 }
 0x71f   :  { %v737_v44 = vsel %vm333_vm5, %v735_v43, -inf }
 0x720   :  { %738 = vmax.xlane.f32.xlu1 %v737_v44 }
 0x7a6   :  { %v742_v45 = vpop.xlane.xlu0 %741 }
 0x7a7   :  { %v744_v46 = vsub.f32 %v736_v38, %v742_v45 }
 0x7a9   :  { %v747_v48 = vmul.f32 1.442695, %v744_v46  ;;  %v739_v51 = vpop.xlane.xlu1 %738 }
 0x7aa   :  { %v743_v52 = vsub.f32 %v735_v43, %v739_v51 }
 0x7ab   :  { %1141 = vpow2.f32 %v747_v48 }
 0x7ac   :  { %v745_v54 = vmul.f32 1.442695, %v743_v52 }
 0x7ae   :  { %1143 = vpow2.f32 %v745_v54  ;;  %v1004_v54 = vld [vmem:[%s1567_s10] ss:$0 sm:$0xff] }
 0x7b8   :  { %v1142_v57 = vpop.eup %1141 }
 0x7b9   :  { %v752_v11 = vsel %vm333_vm5, %v1142_v57, 0.0 }
 0x7ba   :  { %753 = vadd.xlane.f32.xlu0 %v752_v11 }
 0x7bb   :  { %v1144_v61 = vpop.eup %1143 }
 0x7bc   :  { %v749_v62 = vsel %vm333_vm5, %v1144_v61, 0.0 }
 0x7bd   :  { %750 = vadd.xlane.f32.xlu1 %v749_v62 }
 0x843   :  { %v754_v17 = vpop.xlane.xlu0 %753 }
 0x844   :  { %1145 = vrcp.f32 %v754_v17 }
 0x846   :  { %v751_v0 = vpop.xlane.xlu1 %750 }
 0x847   :  { %1147 = vrcp.f32 %v751_v0 }
 0x851   :  { %v1146_v3 = vpop.eup %1145 }
 0x852   :  { %v758_v4 = vmul.f32 %v1146_v3, %v1142_v57  ;;  %v1005_v3 = vld [vmem:[#allocation2] ss:$0 sm:$0xff] }
 0x854   :  { %v1148_v5 = vpop.eup %1147  ;;  %v761_v6 = vmul.f32 %v758_v4, %v1386_v50  ;;  %v769_v12 = vmul.f32 %v758_v4, %v1389_v53  ;;  %v777_v34 = vmul.f32 %v758_v4, %v1395_v59 }
 0x855   :  { %v756_v7 = vmul.f32 %v1148_v5, %v1144_v61 }
 0x856   :  { %v765_v8 = vsel %vm333_vm5, %v761_v6, 0.0  ;;  %v773_v1 = vsel %vm333_vm5, %v769_v12, 0.0  ;;  %v781_v53 = vsel %vm333_vm5, %v777_v34, 0.0 }
 0x857   :  { %766 = vadd.xlane.f32.xlu0 %v765_v8  ;;  %v760_v13 = vmul.f32 %v756_v7, %v1384_v49  ;;  %v759_v14 = vpack.c.bf16 %v758_v4, %v756_v7  ;;  %v768_v16 = vmul.f32 %v756_v7, %v1392_v56  ;;  %v776_v22 = vmul.f32 %v756_v7, %v1397_v60 }
 0x858   :  { %v785_v49 = vmul.f32 %v758_v4, %v1400_v63  ;;  %v784_v56 = vmul.f32 %v756_v7, %v1405_v9  ;;  %v802_v60 = vsel %vm404_vm4, %v1472_v47, 0 }
 0x859   :  { %v762_v15 = vsel %vm333_vm5, %v760_v13, 0.0  ;;  %v770_v50 = vsel %vm333_vm5, %v768_v16, 0.0  ;;  %v778_v18 = vsel %vm333_vm5, %v776_v22, 0.0  ;;  %1079 = vmatpush3.bf16.msra.mxu1 %v802_v60 }
 0x85a   :  { %763 = vadd.xlane.f32.xlu1 %v762_v15  ;;  %v789_v33 = vsel %vm333_vm5, %v785_v49, 0.0  ;;  %v786_v59 = vsel %vm333_vm5, %v784_v56, 0.0  ;;  %1090 = vmatprep.subr.bf16.mxu1 %v1246_v10 }
 0x85b   :  { %774 = vadd.xlane.f32.xlu0 %v773_v1 }
 0x85e   :  { %771 = vadd.xlane.f32.xlu1 %v770_v50 }
 0x85f   :  { %782 = vadd.xlane.f32.xlu0 %v781_v53 }
 0x862   :  { %779 = vadd.xlane.f32.xlu1 %v778_v18 }
 0x863   :  { %790 = vadd.xlane.f32.xlu0 %v789_v33 }
 0x866   :  { %787 = vadd.xlane.f32.xlu1 %v786_v59 }
 0x877   :  { %845 = vrot.lane.b32.xlu1 %v1485_v2, %s1253_s19 }
 0x879   :  { %894 = vrot.lane.b32.xlu0 %v1477_v55, %s1254_s20 }
 0x87b   :  { %896 = vrot.lane.b32.xlu1 %v1479_v58, %s1254_s20 }
 0x8e0   :  { %v767_v63 = vpop.xlane.xlu0 %766 }
 0x8e3   :  { %v764_v9 = vpop.xlane.xlu1 %763 }
 0x8e4   :  { %v775_v19 = vpop.xlane.xlu0 %774 }
 0x8e5   :  { %v793_v47 = vsel %vm390_vm6, %v767_v63, %v775_v19 }
 0x8e7   :  { %v772_v20 = vpop.xlane.xlu1 %771 }
 0x8e8   :  { %v783_v21 = vpop.xlane.xlu0 %782  ;;  %v792_v41 = vsel %vm390_vm6, %v764_v9, %v772_v20 }
 0x8e9   :  { %v795_v24 = vsel %vm393_vm7, %v793_v47, %v783_v21 }
 0x8eb   :  { %v780_v39 = vpop.xlane.xlu1 %779 }
 0x8ec   :  { %v791_v23 = vpop.xlane.xlu0 %790  ;;  %v794_v2 = vsel %vm393_vm7, %v792_v41, %v780_v39 }
 0x8ed   :  { %v797_v55 = vsel %vm396_vm8, %v795_v24, %v791_v23 }
 0x8ef   :  { %v788_v25 = vpop.xlane.xlu1 %787 }
 0x8f0   :  { %v796_v58 = vsel %vm396_vm8, %v794_v2, %v788_v25  ;;  %v895_v37 = vpop.permute.xlu0 %894 }
 0x8f1   :  { %v798_v26 = vpack.c.bf16 %v797_v55, %v796_v58 }
 0x8f3   :  { %v846_v27 = vpop.permute.xlu1 %845  ;;  %1081 = vmatmul.mubr.msk.bf16.vlgmr.msra.gmra.mxu1 %vm400_vm9, %v798_v26 }
 0x8f4   :  { %1085 = vmatpush3.bf16.msra.mxu0 %v846_v27  ;;  %1092 = vmatprep.mubr.msk.bf16.mxu1 %vm1247_vm3, %v1246_v10  ;;  %v904_v10 = vld [vmem:[%s1560_s3] sm:$0x3] }
 0x8f5   :  { %v905_v52 = vpack.c.bf16 %v904_v10, %v904_v10 }
 0x8f7   :  { %1087 = vmatmul.mubr.msk.bf16.vlgmr.msra.gmra.mxu0 %vm333_vm5, %v759_v14  ;;  %v897_v43 = vpop.permute.xlu1 %896 }
 0x9b3   :  { %v838_v28 = vpop.f32.mrf.mxu1 }
 0x9b5   :  { %v1082_v29 = vpop.f32.mrf.mxu1 }
 0x9b7   :  { %v841_v30 = vpop.f32.mrf.mxu1  ;;  %v885_v31 = vpop.f32.mrf.mxu0 }
 0x9b8   :  { %v886_v32 = vadd.f32 %v885_v31, %v838_v28 }
 0x9b9   :  { %v1083_v35 = vpop.f32.mrf.mxu1  ;;  %v1088_v36 = vpop.f32.mrf.mxu0 }
 0x9ba   :  { %v900_v40 = vadd.f32 %v895_v37, %v886_v32 }
 0x9bb   :  { %v888_v38 = vpop.f32.mrf.mxu0 }
 0x9bc   :  { %v889_v42 = vadd.f32 %v888_v38, %v841_v30  ;;  %v902_v46 = vmax.f32 %v900_v40, 0.0 }
 0x9bd   :  { %v1089_v44 = vpop.f32.mrf.mxu0 }
 0x9be   :  { %v901_v45 = vadd.f32 %v897_v43, %v889_v42 }
 0x9c0   :  { %v903_v48 = vmax.f32 %v901_v45, 0.0 }
 0x9c2   :  { %v906_v51 = vpack.c.bf16 %v903_v48, %v902_v46 }
 0x9c4   :  { %1091 = vmatpush3.bf16.msra.mxu1 %v906_v51 }
 0x9c7   :  { %1093 = vmatmul.mubr.msk.bf16.vlgmr.msra.gmra.mxu1 %vm333_vm5, %v905_v52 }
 0xa87   :  { %v944_v57 = vpop.f32.mrf.mxu1 }
 0xa88   :  { %v957_v11 = vmul.f32 %v1004_v54, %v944_v57 }
 0xa89   :  { %v1094_v61 = vpop.f32.mrf.mxu1 }
 0xa8a   :  { %v959_v62 = vsel %vm958_vm10, %v957_v11, 0.0 }
 0xa8b   :  { %v947_v17 = vpop.f32.mrf.mxu1  ;;  %960 = vadd.xlane.f32.xlu1 %v959_v62 }
 0xa8d   :  { %v1095_v0 = vpop.f32.mrf.mxu1 }
 0xb14   :  { %v961_v4 = vpop.xlane.xlu1 %960 }
 0xb15   :  { %v969_v5 = vadd.f32 %v1005_v3, %v961_v4 }
 0xb17   :  { %v1006_v6 = vmul.f32 -1.442695, %v969_v5 }
 0xb19   :  { %1149 = vpow2.f32 %v1006_v6 }
 0xb26   :  { %v1150_v7 = vpop.eup %1149 }
 0xb27   :  { %v973_v8 = vadd.f32 1.0, %v1150_v7 }
 0xb29   :  { %1151 = vrcp.f32 %v973_v8 }
 0xb36   :  { %v1152_v12 = vpop.eup %1151 }
 0xb37   :  { %977 = vst.msk [vmem:[%s1569_s12] sm:$0x3] %vm976_vm11, %v1152_v12 }
 0xb38   :  { %982 = vsyncpa [#allocation4], 1 }
 0xb39   :  { %983 = vsyncpa [#allocation6], 1 }
 0xb3a   :  { %984 = vsyncpa [#allocation9], 1 }

</bundles_post_ra>
